<compile_context>
chip_gen: v5e
topology: v5e:2x2
jax: 0.10.0
libtpu: 0.0.40
codegen_flags: <defaults>
</compile_context>

<pallas_src>
import functools

import jax
import jax.numpy as jnp
from jax.experimental import pallas as pl
from jax.experimental.pallas import tpu as pltpu


# ----------------------------- fused kernel ----------------------------------
def _mlp_kernel(num_layers, x_ref, *refs):
    """refs = (w0, b0, w1, b1, ..., w_{L-1}, b_{L-1}, o_ref).

    Chained matmuls + ReLU entirely in VMEM/vregs; only the final result is
    stored back to the output tile.
    """
    o_ref = refs[-1]
    wb = refs[:-1]
    h = x_ref[...]
    for i in range(num_layers):
        w = wb[2 * i][...]
        b = wb[2 * i + 1][...]
        h = jnp.dot(h, w, preferred_element_type=jnp.float32) + b
        if i < num_layers - 1:           # F.relu on all but the last layer
            h = jnp.maximum(h, 0.0)
    o_ref[...] = h.astype(o_ref.dtype)


def pallas_mlp(x, weights, biases, *, block_m=None):
    """y = MLP(x): Linear->ReLU chained, no ReLU after last Linear.

    x: (..., input_dim); weights[i]: (in_i, out_i); biases[i]: (out_i,)
    Applied over the last dim (same as nn.Linear), leading dims flattened into
    the matmul row dimension.
    """
    orig_lead = x.shape[:-1]
    in_dim = x.shape[-1]
    x2d = x.reshape(-1, in_dim).astype(jnp.float32)
    M = x2d.shape[0]
    num_layers = len(weights)
    out_dim = weights[-1].shape[1]

    # Single row-block at small M; tile only if M is large and cleanly divisible
    # (keeps the (8,128)-or-full-dim BlockSpec rule satisfied).
    if block_m is None or block_m >= M or M % block_m != 0 or block_m % 8 != 0:
        block_m = M
    grid = (M // block_m,)

    in_specs = [pl.BlockSpec((block_m, in_dim), lambda i: (i, 0))]
    args = [x2d]
    for w, b in zip(weights, biases):
        K, N = w.shape
        in_specs.append(pl.BlockSpec((K, N), lambda i: (0, 0)))
        in_specs.append(pl.BlockSpec((1, N), lambda i: (0, 0)))
        args.append(w.astype(jnp.float32))
        args.append(b.reshape(1, N).astype(jnp.float32))

    out = pl.pallas_call(
        functools.partial(_mlp_kernel, num_layers),
        out_shape=jax.ShapeDtypeStruct((M, out_dim), jnp.float32),
        grid=grid,
        in_specs=in_specs,
        out_specs=pl.BlockSpec((block_m, out_dim), lambda i: (i, 0)),
        compiler_params=pltpu.CompilerParams(
            dimension_semantics=("parallel",)),   # independent row blocks (v7x: 2 TCs)
    )(*args)
    return out.reshape(*orig_lead, out_dim)


# ----------------------------- reference (plain JAX) -------------------------
def mlp_reference(x, weights, biases):
    num_layers = len(weights)
    h = x
    for i, (w, b) in enumerate(zip(weights, biases)):
        h = h @ w + b
        if i < num_layers - 1:
            h = jax.nn.relu(h)
    return h


# ----------------------------- parameter init --------------------------------
def init_mlp_params(key, input_dim, hidden_dim, output_dim, num_layers):
    """Mirrors MLP.__init__: dims [input] + [hidden]*(L-1) -> [hidden]*(L-1) + [output]."""
    h = [hidden_dim] * (num_layers - 1)
    in_dims = [input_dim] + h
    out_dims = h + [output_dim]
    weights, biases = [], []
    ks = jax.random.split(key, num_layers)
    for k, n_in, n_out in zip(ks, in_dims, out_dims):
        kw, kb = jax.random.split(k)
        bound = 1.0 / (n_in ** 0.5)       # nn.Linear default uniform init range
        weights.append(jax.random.uniform(kw, (n_in, n_out), jnp.float32, -bound, bound))
        biases.append(jax.random.uniform(kb, (n_out,), jnp.float32, -bound, bound))
    return weights, biases


# ----------------------------- main -------------------------------------------
if __name__ == "__main__":
    # Shapes consistent with how this MLP is used (e.g. bbox head in a DETR-style
    # decoder): x = (batch, num_queries, hidden_dim), 3-layer MLP -> 4 outputs.
    BATCH, NUM_QUERIES = 2, 16
    INPUT_DIM, HIDDEN_DIM, OUTPUT_DIM, NUM_LAYERS = 32, 64, 4, 3

    key = jax.random.PRNGKey(0)
    kx, kp = jax.random.split(key)
    x = jax.random.normal(kx, (BATCH, NUM_QUERIES, INPUT_DIM), dtype=jnp.float32)
    weights, biases = init_mlp_params(kp, INPUT_DIM, HIDDEN_DIM, OUTPUT_DIM, NUM_LAYERS)

    y = pallas_mlp(x, weights, biases)
    jax.block_until_ready(y)

    assert y.shape == (BATCH, NUM_QUERIES, OUTPUT_DIM)
    y_ref = mlp_reference(x, weights, biases)
    assert jnp.allclose(y, y_ref, atol=1e-5, rtol=1e-5), "mismatch vs JAX reference"

    print("KERNEL_OK")
</pallas_src>

<mosaic_0001>
module attributes {stable_mosaic.version = 11 : i64} {
  func.func @_mlp_kernel(%arg0: i32, %arg1: memref<32x32xf32, #tpu.memory_space<vmem>>, %arg2: memref<32x64xf32, #tpu.memory_space<vmem>>, %arg3: memref<1x64xf32, #tpu.memory_space<vmem>>, %arg4: memref<64x64xf32, #tpu.memory_space<vmem>>, %arg5: memref<1x64xf32, #tpu.memory_space<vmem>>, %arg6: memref<64x4xf32, #tpu.memory_space<vmem>>, %arg7: memref<1x4xf32, #tpu.memory_space<vmem>>, %arg8: memref<32x4xf32, #tpu.memory_space<vmem>>) attributes {dimension_semantics = [#tpu.dimension_semantics<parallel>], iteration_bounds = array<i64: 1>, scalar_prefetch = 0 : i64, scratch_operands = 0 : i64, tpu.core_type = #tpu.core_type<tc>, window_params = [{transform_indices = @transform_0, window_bounds = array<i64: 32, 32>}, {pipeline_mode = #tpu.pipeline_mode<synchronous>, transform_indices = @transform_1, window_bounds = array<i64: 32, 64>}, {pipeline_mode = #tpu.pipeline_mode<synchronous>, transform_indices = @transform_2, window_bounds = array<i64: 1, 64>}, {pipeline_mode = #tpu.pipeline_mode<synchronous>, transform_indices = @transform_3, window_bounds = array<i64: 64, 64>}, {pipeline_mode = #tpu.pipeline_mode<synchronous>, transform_indices = @transform_4, window_bounds = array<i64: 1, 64>}, {pipeline_mode = #tpu.pipeline_mode<synchronous>, transform_indices = @transform_5, window_bounds = array<i64: 64, 4>}, {pipeline_mode = #tpu.pipeline_mode<synchronous>, transform_indices = @transform_6, window_bounds = array<i64: 1, 4>}, {transform_indices = @transform_7, window_bounds = array<i64: 32, 4>}]} {
    %c0 = arith.constant 0 : index
    %c0_0 = arith.constant 0 : index
    %0 = vector.load %arg1[%c0, %c0_0] : memref<32x32xf32, #tpu.memory_space<vmem>>, vector<32x32xf32>
    %c0_1 = arith.constant 0 : index
    %c0_2 = arith.constant 0 : index
    %1 = vector.load %arg2[%c0_1, %c0_2] : memref<32x64xf32, #tpu.memory_space<vmem>>, vector<32x64xf32>
    %c0_3 = arith.constant 0 : index
    %c0_4 = arith.constant 0 : index
    %2 = vector.load %arg3[%c0_3, %c0_4] : memref<1x64xf32, #tpu.memory_space<vmem>>, vector<1x64xf32>
    %cst = arith.constant dense<0.000000e+00> : vector<32x64xf32>
    %3 = tpu.matmul %0, %1, %cst {dimension_numbers = #tpu.dot_dimension_numbers<[1], [0], [0], [1], [0, 0, 1, 1], [], []>} : vector<32x32xf32>, vector<32x64xf32>, vector<32x64xf32> -> vector<32x64xf32>
    %4 = vector.broadcast %2 : vector<1x64xf32> to vector<32x64xf32>
    %5 = arith.addf %3, %4 : vector<32x64xf32>
    %cst_5 = arith.constant 0.000000e+00 : f32
    %6 = vector.broadcast %cst_5 : f32 to vector<32x64xf32>
    %7 = arith.maximumf %5, %6 : vector<32x64xf32>
    %c0_6 = arith.constant 0 : index
    %c0_7 = arith.constant 0 : index
    %8 = vector.load %arg4[%c0_6, %c0_7] : memref<64x64xf32, #tpu.memory_space<vmem>>, vector<64x64xf32>
    %c0_8 = arith.constant 0 : index
    %c0_9 = arith.constant 0 : index
    %9 = vector.load %arg5[%c0_8, %c0_9] : memref<1x64xf32, #tpu.memory_space<vmem>>, vector<1x64xf32>
    %cst_10 = arith.constant dense<0.000000e+00> : vector<32x64xf32>
    %10 = tpu.matmul %7, %8, %cst_10 {dimension_numbers = #tpu.dot_dimension_numbers<[1], [0], [0], [1], [0, 0, 1, 1], [], []>} : vector<32x64xf32>, vector<64x64xf32>, vector<32x64xf32> -> vector<32x64xf32>
    %11 = vector.broadcast %9 : vector<1x64xf32> to vector<32x64xf32>
    %12 = arith.addf %10, %11 : vector<32x64xf32>
    %cst_11 = arith.constant 0.000000e+00 : f32
    %13 = vector.broadcast %cst_11 : f32 to vector<32x64xf32>
    %14 = arith.maximumf %12, %13 : vector<32x64xf32>
    %c0_12 = arith.constant 0 : index
    %c0_13 = arith.constant 0 : index
    %15 = vector.load %arg6[%c0_12, %c0_13] : memref<64x4xf32, #tpu.memory_space<vmem>>, vector<64x4xf32>
    %c0_14 = arith.constant 0 : index
    %c0_15 = arith.constant 0 : index
    %16 = vector.load %arg7[%c0_14, %c0_15] : memref<1x4xf32, #tpu.memory_space<vmem>>, vector<1x4xf32>
    %cst_16 = arith.constant dense<0.000000e+00> : vector<32x4xf32>
    %17 = tpu.matmul %14, %15, %cst_16 {dimension_numbers = #tpu.dot_dimension_numbers<[1], [0], [0], [1], [0, 0, 1, 1], [], []>} : vector<32x64xf32>, vector<64x4xf32>, vector<32x4xf32> -> vector<32x4xf32>
    %18 = vector.broadcast %16 : vector<1x4xf32> to vector<32x4xf32>
    %19 = arith.addf %17, %18 : vector<32x4xf32>
    %c0_17 = arith.constant 0 : index
    %c0_18 = arith.constant 0 : index
    %20 = vector.load %arg8[%c0_17, %c0_18] : memref<32x4xf32, #tpu.memory_space<vmem>>, vector<32x4xf32>
    tpu.vector_store %arg8[%c0_17, %c0_18], %19 {strides = array<i32>} : memref<32x4xf32, #tpu.memory_space<vmem>>, vector<32x4xf32>,
    return
  }
  func.func @transform_0(%arg0: i32) -> (i32, i32) {
    %c0_i32 = arith.constant 0 : i32
    %c0_i32_0 = arith.constant 0 : i32
    return %arg0, %c0_i32 : i32, i32
  }
  func.func @transform_1(%arg0: i32) -> (i32, i32) {
    %c0_i32 = arith.constant 0 : i32
    %c0_i32_0 = arith.constant 0 : i32
    %c0_i32_1 = arith.constant 0 : i32
    return %c0_i32, %c0_i32_0 : i32, i32
  }
  func.func @transform_2(%arg0: i32) -> (i32, i32) {
    %c0_i32 = arith.constant 0 : i32
    %c0_i32_0 = arith.constant 0 : i32
    %c0_i32_1 = arith.constant 0 : i32
    return %c0_i32, %c0_i32_0 : i32, i32
  }
  func.func @transform_3(%arg0: i32) -> (i32, i32) {
    %c0_i32 = arith.constant 0 : i32
    %c0_i32_0 = arith.constant 0 : i32
    %c0_i32_1 = arith.constant 0 : i32
    return %c0_i32, %c0_i32_0 : i32, i32
  }
  func.func @transform_4(%arg0: i32) -> (i32, i32) {
    %c0_i32 = arith.constant 0 : i32
    %c0_i32_0 = arith.constant 0 : i32
    %c0_i32_1 = arith.constant 0 : i32
    return %c0_i32, %c0_i32_0 : i32, i32
  }
  func.func @transform_5(%arg0: i32) -> (i32, i32) {
    %c0_i32 = arith.constant 0 : i32
    %c0_i32_0 = arith.constant 0 : i32
    %c0_i32_1 = arith.constant 0 : i32
    return %c0_i32, %c0_i32_0 : i32, i32
  }
  func.func @transform_6(%arg0: i32) -> (i32, i32) {
    %c0_i32 = arith.constant 0 : i32
    %c0_i32_0 = arith.constant 0 : i32
    %c0_i32_1 = arith.constant 0 : i32
    return %c0_i32, %c0_i32_0 : i32, i32
  }
  func.func @transform_7(%arg0: i32) -> (i32, i32) {
    %c0_i32 = arith.constant 0 : i32
    %c0_i32_0 = arith.constant 0 : i32
    return %arg0, %c0_i32 : i32, i32
  }
}

</mosaic_0001>

<bundles_post_ra>
// kernel: tpu_custom_call.1
= control target key start
LH: loop header
LB: loop body
LE: loop exit
PB: predicated region body
PF: predicated region fallthrough
CT: control target
= control target key end

     0   :  { %12 = vsyncpa [#allocation3], 0  ;;  %s456_s0 = inlined_call_operand.hbm [shape: f32[32,32], index: 0, kind: input, shape index: {}]   ;;  %s457_s1 = inlined_call_operand.hbm [shape: f32[32,64], index: 1, kind: input, shape index: {}]   ;;  %s458_s2 = inlined_call_operand.vmem [shape: f32[1,64], index: 2, kind: input, shape index: {}]   ;;  %s459_s3 = inlined_call_operand.vmem [shape: f32[64,64], index: 3, kind: input, shape index: {}]   ;;  %s460_s4 = inlined_call_operand.vmem [shape: f32[1,64], index: 4, kind: input, shape index: {}]   ;;  %s461_s5 = inlined_call_operand.vmem [shape: f32[64,4], index: 5, kind: input, shape index: {}]   ;;  %s462_s6 = inlined_call_operand.vmem [shape: f32[1,4], index: 6, kind: input, shape index: {}]   ;;  %s463_s7 = inlined_call_operand.vmem [shape: f32[32,4], index: 7, kind: output, shape index: {}]  }
   0x1   :  { %s18_s26 = sshll.u32 %s456_s0, 4  ;;  %s19_s26 = int_to_ptr.hbm [resolvable:$true] %s18_s26 }
   0x2   :  { %13 = vsyncpa [#allocation5], 0  ;;  %s325_s27 = smov [#allocation2]   ;;  %s31_s8 = sshll.u32 %s457_s1, 4  ;;  %s32_s8 = int_to_ptr.hbm [resolvable:$true] %s31_s8 }
   0x3   :  { %s20_s28 = sshll.u32 %s325_s27, 4  ;;  %s326_s9 = smov 128   ;;  %s21_s28 = int_to_ptr.vmem [resolvable:$true] %s20_s28 }
   0x4   :  { %s327_s10 = smov 8   ;;  %s328_s11 = smov [#allocation4]  }
   0x5   :  { %26 = dma.hbm_to_vmem [thread:$0]  %s19_s26, 512, %s21_s28, [#allocation3], %s326_s9, %s326_s9, %s327_s10  }
   0x6   :  { %s33_s12 = sshll.u32 %s328_s11, 4  ;;  %s34_s12 = int_to_ptr.vmem [resolvable:$true] %s33_s12 }
   0x7   :  { %39 = dma.hbm_to_vmem [thread:$0]  %s32_s8, 512, %s34_s12, [#allocation5], %s326_s9, %s326_s9, %s327_s10  }
   0x8   :  { %321 = dma.done.wait [#allocation3], 512  }
   0x9   :  { %322 = vsyncadd [#allocation3], 4294966784 }
   0xa   :  { %323 = dma.done.wait [#allocation5], 512  }
   0xb   :  { %324 = vsyncadd [#allocation5], 4294966784  ;;  %v65_v0 = vld [vmem:[#allocation4 + $0x18] sm:$0xff]  ;;  %v64_v1 = vld [vmem:[#allocation4 + $0x10] sm:$0xff]  ;;  %vm70_vm0 = vcmask 261120   ;;  %vm128_vm1 = vcmask 523264  }
   0xc   :  { %95 = vmatpush.msra.mxu0 %v65_v0  ;;  %v63_v2 = vld [vmem:[#allocation4 + $0x8] sm:$0xff]  ;;  %v123_v3 = vld [vmem:[%s459_s3 + $0x38] sm:$0xff]  ;;  %v122_v4 = vld [vmem:[%s459_s3 + $0x30] sm:$0xff]  ;;  %vm227_vm2 = vcmask 31744  }
   0xd   :  { %149 = vmatpush.msra.mxu1 %v123_v3  ;;  %v62_v5 = vld [vmem:[#allocation4] sm:$0xff]  ;;  %v121_v6 = vld [vmem:[%s459_s3 + $0x28] sm:$0xff]  ;;  %250 = vmatpush.msra.mxu3 %v123_v3  ;;  %v119_v9 = vld [vmem:[%s459_s3 + $0x18] sm:$0xff] }
   0xe   :  { %96 = vmatpush.msra.mxu0 %v64_v1  ;;  %v58_v7 = vld [vmem:[#allocation2] sm:$0xff]  ;;  %v59_v10 = vld [vmem:[#allocation2 + $0x8] sm:$0xff]  ;;  %v60_v11 = vld [vmem:[#allocation2 + $0x10] sm:$0xff] }
   0xf   :  { %150 = vmatpush.msra.mxu1 %v122_v4  ;;  %v120_v8 = vld [vmem:[%s459_s3 + $0x20] sm:$0xff]  ;;  %251 = vmatpush.msra.mxu3 %v122_v4  ;;  %v61_v12 = vld [vmem:[#allocation2 + $0x18] sm:$0xff]  ;;  %v118_v13 = vld [vmem:[%s459_s3 + $0x10] sm:$0xff] }
  0x10   :  { %97 = vmatpush.msra.mxu0 %v63_v2  ;;  %v117_v14 = vld [vmem:[%s459_s3 + $0x8] sm:$0xff]  ;;  %v116_v15 = vld [vmem:[%s459_s3] sm:$0xff]  ;;  %v181_v17 = vld [vmem:[%s461_s5 + $0x38] sm:$0xff] }
  0x11   :  { %151 = vmatpush.msra.mxu1 %v121_v6  ;;  %252 = vmatpush.msra.mxu3 %v121_v6  ;;  %v270_v16 = vld [vmem:[%s458_s2] ss:$0 sm:$0xff]  ;;  %v180_v18 = vld [vmem:[%s461_s5 + $0x30] sm:$0xff]  ;;  %v179_v19 = vld [vmem:[%s461_s5 + $0x28] sm:$0xff] }
  0x12   :  { %98 = vmatpush.msra.mxu0 %v62_v5  ;;  %258 = vmatpush.msra.mxu2 %v181_v17  ;;  %v178_v22 = vld [vmem:[%s461_s5 + $0x20] sm:$0xff]  ;;  %v177_v24 = vld [vmem:[%s461_s5 + $0x18] sm:$0xff]  ;;  %v176_v34 = vld [vmem:[%s461_s5 + $0x10] sm:$0xff] }
  0x13   :  { %238 = vmatmul.msk.f32.vlgmr.msra.gmra.mxu0 %vm70_vm0, %v58_v7  ;;  %152 = vmatpush.msra.mxu1 %v120_v8  ;;  %v175_v35 = vld [vmem:[%s461_s5 + $0x8] sm:$0xff]  ;;  %v174_v36 = vld [vmem:[%s461_s5] sm:$0xff] }
  0x14   :  { %253 = vmatpush.msra.mxu3 %v120_v8  ;;  %259 = vmatpush.msra.mxu2 %v180_v18  ;;  %v271_v37 = vld [vmem:[%s460_s4] ss:$0 sm:$0xff] }
  0x15   :  { %153 = vmatpush.msra.mxu1 %v119_v9  ;;  %v272_v50 = vld [vmem:[%s462_s6] ss:$0 sm:$0xff] }
  0x16   :  { %254 = vmatpush.msra.mxu3 %v119_v9  ;;  %260 = vmatpush.msra.mxu2 %v179_v19 }
  0x17   :  { %154 = vmatpush.msra.mxu1 %v118_v13 }
  0x18   :  { %255 = vmatpush.msra.mxu3 %v118_v13  ;;  %261 = vmatpush.msra.mxu2 %v178_v22 }
  0x19   :  { %155 = vmatpush.msra.mxu1 %v117_v14 }
  0x1a   :  { %256 = vmatpush.msra.mxu3 %v117_v14  ;;  %262 = vmatpush.msra.mxu2 %v177_v24 }
  0x1b   :  { %239 = vmatmul.msk.f32.gmra.mxu0 %vm70_vm0, %v59_v10  ;;  %156 = vmatpush.msra.mxu1 %v116_v15 }
  0x1c   :  { %257 = vmatpush.msra.mxu3 %v116_v15  ;;  %263 = vmatpush.msra.mxu2 %v176_v34 }
  0x1d   :  { %206 = vmatpush.msrb.mxu1 %v181_v17 }
  0x1e   :  { %264 = vmatpush.msra.mxu2 %v175_v35 }
  0x1f   :  { %207 = vmatpush.msrb.mxu1 %v180_v18 }
  0x20   :  { %265 = vmatpush.msra.mxu2 %v174_v36 }
  0x21   :  { %208 = vmatpush.msrb.mxu1 %v179_v19 }
  0x23   :  { %240 = vmatmul.msk.f32.gmra.mxu0 %vm70_vm0, %v60_v11  ;;  %209 = vmatpush.msrb.mxu1 %v178_v22 }
  0x25   :  { %210 = vmatpush.msrb.mxu1 %v177_v24 }
  0x27   :  { %211 = vmatpush.msrb.mxu1 %v176_v34 }
  0x29   :  { %212 = vmatpush.msrb.mxu1 %v175_v35 }
  0x2b   :  { %241 = vmatmul.msk.f32.gmra.mxu0 %vm70_vm0, %v61_v12  ;;  %213 = vmatpush.msrb.mxu1 %v174_v36 }
  0x90   :  { %v100_v20 = vpop.f32.mrf.mxu0 }
  0x91   :  { %v101_v21 = vadd.f32 %v270_v16, %v100_v20 }
  0x93   :  { %v112_v23 = vmax.f32 %v101_v21, 0.0 }
  0x95   :  { %242 = vmatmul.msk.f32.vlgmr.msra.gmra.mxu1 %vm128_vm1, %v112_v23 }
  0x98   :  { %v103_v25 = vpop.f32.mrf.mxu0 }
  0x99   :  { %v104_v26 = vadd.f32 %v270_v16, %v103_v25 }
  0x9b   :  { %v113_v27 = vmax.f32 %v104_v26, 0.0 }
  0x9d   :  { %243 = vmatmul.msk.f32.vlgmr.msra.gmra.mxu3 %vm128_vm1, %v113_v27 }
  0xa0   :  { %v106_v28 = vpop.f32.mrf.mxu0 }
  0xa1   :  { %v107_v29 = vadd.f32 %v270_v16, %v106_v28 }
  0xa3   :  { %v114_v30 = vmax.f32 %v107_v29, 0.0 }
  0xa5   :  { %244 = vmatmul.msk.f32.gmra.mxu3 %vm128_vm1, %v114_v30 }
  0xa8   :  { %v109_v31 = vpop.f32.mrf.mxu0 }
  0xa9   :  { %v110_v32 = vadd.f32 %v270_v16, %v109_v31 }
  0xab   :  { %v115_v33 = vmax.f32 %v110_v32, 0.0 }
  0xad   :  { %245 = vmatmul.msk.f32.gmra.mxu3 %vm128_vm1, %v115_v33 }
 0x112   :  { %v158_v38 = vpop.f32.mrf.mxu1 }
 0x113   :  { %v159_v39 = vadd.f32 %v271_v37, %v158_v38 }
 0x115   :  { %v170_v40 = vmax.f32 %v159_v39, 0.0 }
 0x117   :  { %246 = vmatmul.msk.f32.vlgmr.msrb.gmra.mxu1 %vm128_vm1, %v170_v40 }
 0x120   :  { %v161_v41 = vpop.f32.mrf.mxu3 }
 0x121   :  { %v162_v42 = vadd.f32 %v271_v37, %v161_v41 }
 0x123   :  { %v171_v43 = vmax.f32 %v162_v42, 0.0 }
 0x125   :  { %247 = vmatmul.msk.f32.vlgmr.msra.gmra.mxu2 %vm128_vm1, %v171_v43 }
 0x128   :  { %v164_v44 = vpop.f32.mrf.mxu3 }
 0x129   :  { %v165_v45 = vadd.f32 %v271_v37, %v164_v44 }
 0x12b   :  { %v172_v46 = vmax.f32 %v165_v45, 0.0 }
 0x12d   :  { %248 = vmatmul.msk.f32.gmra.mxu2 %vm128_vm1, %v172_v46 }
 0x130   :  { %v167_v47 = vpop.f32.mrf.mxu3 }
 0x131   :  { %v168_v48 = vadd.f32 %v271_v37, %v167_v47 }
 0x133   :  { %v173_v49 = vmax.f32 %v168_v48, 0.0 }
 0x135   :  { %249 = vmatmul.msk.f32.gmra.mxu2 %vm128_vm1, %v173_v49 }
 0x194   :  { %v215_v51 = vpop.f32.mrf.mxu1 }
 0x195   :  { %v216_v52 = vadd.f32 %v272_v50, %v215_v51 }
 0x197   :  { %228 = vst.msk [vmem:[%s463_s7] sm:$0xff] %vm227_vm2, %v216_v52 }
 0x1a8   :  { %v218_v53 = vpop.f32.mrf.mxu2 }
 0x1a9   :  { %v219_v54 = vadd.f32 %v272_v50, %v218_v53 }
 0x1ab   :  { %229 = vst.msk [vmem:[%s463_s7 + $0x8] sm:$0xff] %vm227_vm2, %v219_v54 }
 0x1b0   :  { %v221_v55 = vpop.f32.mrf.mxu2 }
 0x1b1   :  { %v222_v56 = vadd.f32 %v272_v50, %v221_v55 }
 0x1b3   :  { %230 = vst.msk [vmem:[%s463_s7 + $0x10] sm:$0xff] %vm227_vm2, %v222_v56 }
 0x1b8   :  { %v224_v57 = vpop.f32.mrf.mxu2 }
 0x1b9   :  { %v225_v58 = vadd.f32 %v272_v50, %v224_v57 }
 0x1bb   :  { %231 = vst.msk [vmem:[%s463_s7 + $0x18] sm:$0xff] %vm227_vm2, %v225_v58 }
 0x1bc   :  { %236 = vsyncpa [#allocation3], 1 }
 0x1bd   :  { %237 = vsyncpa [#allocation5], 1 }

</bundles_post_ra>
